<compile_context>
chip_gen: v6e
topology: v6e:2x2x1
jax: 0.10.0
libtpu: 0.0.40
codegen_flags: <defaults>
</compile_context>

<pallas_src>
import functools

import jax
import jax.numpy as jnp
import numpy as np
from jax.experimental import pallas as pl
from jax.experimental.pallas import tpu as pltpu


# ---------------------------------------------------------------------------
# Static (trace-time) helpers: Gaussian taps and the banded Toeplitz matrices.
# ---------------------------------------------------------------------------
def _round_up(x: int, m: int) -> int:
    return ((x + m - 1) // m) * m


def _gaussian_taps(window_size: int, sigma: float) -> np.ndarray:
    # Matches prnet_loss.gaussian(): exp(-(x - ws//2)^2 / (2*sigma^2)), sum-normalized.
    x = np.arange(window_size, dtype=np.float64)
    g = np.exp(-((x - window_size // 2) ** 2) / (2.0 * sigma ** 2))
    g = g / g.sum()
    return g.astype(np.float32)


def _width_toeplitz(w: int, wp: int, wp_pad: int, taps: np.ndarray) -> np.ndarray:
    # (x @ T)[j] = sum_k taps[k] * x[j + k] for j < wp ; columns >= wp are zero padding.
    ws = taps.shape[0]
    t = np.zeros((w, wp_pad), dtype=np.float32)
    for j in range(wp):
        t[j:j + ws, j] = taps
    return t


def _height_toeplitz(h: int, hp: int, hp_pad: int, taps: np.ndarray) -> np.ndarray:
    # (T @ y)[i] = sum_k taps[k] * y[i + k] for i < hp ; rows >= hp are zero padding.
    ws = taps.shape[0]
    t = np.zeros((hp_pad, h), dtype=np.float32)
    for i in range(hp):
        t[i, i:i + ws] = taps
    return t


# ---------------------------------------------------------------------------
# Kernel: one (batch, channel) tile per grid step -> one partial SSIM sum.
# ---------------------------------------------------------------------------
def _ssim_partial_kernel(img1_ref, img2_ref, mask_ref, tw_ref, th_ref, out_ref,
                         *, hp, wp, c1, c2, approx_recip):
    H, W = mask_ref.shape
    hp_pad = th_ref.shape[0]
    wp_pad = tw_ref.shape[1]

    m = mask_ref[...]                                     # (H, W) f32
    x1 = img1_ref[0, 0].astype(jnp.float32) * m           # (H, W) f32 (bf16 inputs upcast)
    x2 = img2_ref[0, 0].astype(jnp.float32) * m

    # Fuse the four conv inputs along the sublane dim -> ONE width matmul feeds all four.
    stack = jnp.concatenate([x1, x2, x1 * x2, x1 * x1 + x2 * x2], axis=0)   # (4H, W)

    tw = tw_ref[...]                                      # (W, wp_pad)  zero-padded cols
    th = th_ref[...]                                      # (hp_pad, H)  zero-padded rows

    # Width (lane-dim) VALID Gaussian conv on the MXU, lane-dense output.
    hx = jnp.dot(stack, tw, preferred_element_type=jnp.float32)             # (4H, wp_pad)

    # Height (sublane-dim) VALID Gaussian conv, also on the MXU: 4 small Toeplitz
    # matmuls over sublane-aligned slices of hx (static Python loop -> 4 dots).
    def hconv(f):
        return jnp.dot(th, hx[f * H:(f + 1) * H, :],
                       preferred_element_type=jnp.float32)                  # (hp_pad, wp_pad)

    mu1, mu2, s12, ssq = hconv(0), hconv(1), hconv(2), hconv(3)

    num0 = 2.0 * mu1 * mu2
    den0 = mu1 * mu1 + mu2 * mu2
    num_l = num0 + c1
    den_l = den0 + c1
    num_c = 2.0 * s12 - num0 + c2
    den_c = ssq - den0 + c2

    if approx_recip:
        # EUP approximate reciprocal keeps the divides off the VALU.
        lum = num_l * pl.reciprocal(den_l, approx=True)
        cs = num_c * pl.reciprocal(den_c, approx=True)
    else:
        lum = num_l / den_l
        cs = num_c / den_c

    # Exclude the zero-padded rows/cols exactly (each padded position would otherwise
    # contribute ~1.0 = (c1/c1)*(c2/c2) to the sum).
    row = jax.lax.broadcasted_iota(jnp.int32, (hp_pad, wp_pad), 0)
    col = jax.lax.broadcasted_iota(jnp.int32, (hp_pad, wp_pad), 1)
    valid = jnp.logical_and(row < hp, col < wp)
    partial = jnp.sum(jnp.where(valid, lum * cs, 0.0))

    out_ref[...] = partial.reshape(1, 1, 1, 1)


# ---------------------------------------------------------------------------
# Wrapper == SSIM.forward (mask is the preprocessed module buffer).
# ---------------------------------------------------------------------------
def ssim_loss(img1, img2, mask, *, window_size=11, sigma=1.5, val_range=1.0,
              approx_recip=True):
    B, C, H, W = img1.shape
    assert img2.shape == img1.shape
    assert mask.shape == (H, W)

    real_size = min(window_size, H, W)
    hp = H - real_size + 1
    wp = W - real_size + 1
    hp_pad = _round_up(hp, 8)      # sublane-aligned conv rows
    wp_pad = _round_up(wp, 128)    # lane-dense conv columns

    taps = _gaussian_taps(real_size, sigma)
    tw = jnp.asarray(_width_toeplitz(W, wp, wp_pad, taps))      # (W, wp_pad)
    th = jnp.asarray(_height_toeplitz(H, hp, hp_pad, taps))     # (hp_pad, H)

    c1 = float((0.01 * val_range) ** 2)
    c2 = float((0.03 * val_range) ** 2)

    kernel = functools.partial(_ssim_partial_kernel, hp=hp, wp=wp, c1=c1, c2=c2,
                               approx_recip=approx_recip)

    flops = B * C * (2 * (4 * H) * W * wp_pad           # fused width Toeplitz matmul
                     + 4 * 2 * hp_pad * H * wp_pad      # 4 height Toeplitz matmuls
                     + 20 * hp_pad * wp_pad)            # pointwise epilogue
    bytes_accessed = (2 * B * C * H * W * img1.dtype.itemsize            # images
                      + 4 * (H * W + W * wp_pad + hp_pad * H)            # mask + Toeplitz
                      + 4 * B * C)                                       # partial sums
    transcendentals = 2 * B * C * hp_pad * wp_pad if approx_recip else 0

    partials = pl.pallas_call(
        kernel,
        out_shape=jax.ShapeDtypeStruct((B, C, 1, 1), jnp.float32),
        grid_spec=pltpu.PrefetchScalarGridSpec(
            num_scalar_prefetch=0,
            grid=(B, C),
            in_specs=[
                pl.BlockSpec((1, 1, H, W), lambda b, c: (b, c, 0, 0)),
                pl.BlockSpec((1, 1, H, W), lambda b, c: (b, c, 0, 0)),
                # Constant block indices -> fetched once, stay resident across steps.
                pl.BlockSpec((H, W), lambda b, c: (0, 0)),
                pl.BlockSpec((W, wp_pad), lambda b, c: (0, 0)),
                pl.BlockSpec((hp_pad, H), lambda b, c: (0, 0)),
            ],
            out_specs=pl.BlockSpec((1, 1, 1, 1), lambda b, c: (b, c, 0, 0)),
        ),
        compiler_params=pltpu.CompilerParams(
            dimension_semantics=("parallel", "parallel"),
            # Explicit budget: ~8 MB/step at 256x256 crops; leaves headroom on v7x's
            # 64 MiB physical VMEM.  Row-tiling with a (ws-1) halo is only needed for
            # much larger crops.
            vmem_limit_bytes=32 * 1024 * 1024,
        ),
        cost_estimate=pl.CostEstimate(
            flops=flops, transcendentals=transcendentals,
            bytes_accessed=bytes_accessed),
    )(img1, img2, mask.astype(jnp.float32), tw, th)

    # loss = 10 * (1 - mean(luminance*cs)) / 2
    mean_ssim = jnp.sum(partials) / jnp.float32(B * C * hp * wp)
    return 5.0 * (1.0 - mean_ssim)


# ---------------------------------------------------------------------------
# Pure-JAX reference (direct transcription of dfl_ssim) and test harness.
# ---------------------------------------------------------------------------
def _reference_ssim_loss(img1, img2, mask, *, window_size=11, sigma=1.5, val_range=1.0):
    B, C, H, W = img1.shape
    real_size = min(window_size, H, W)
    taps = _gaussian_taps(real_size, sigma)
    w2d = np.outer(taps, taps).astype(np.float32)
    window = jnp.asarray(np.tile(w2d[None, None], (C, 1, 1, 1)))   # (C,1,ws,ws)

    x1 = img1.astype(jnp.float32) * mask[None, None]
    x2 = img2.astype(jnp.float32) * mask[None, None]

    def conv(x):
        return jax.lax.conv_general_dilated(
            x, window, window_strides=(1, 1), padding="VALID",
            dimension_numbers=("NCHW", "OIHW", "NCHW"), feature_group_count=C,
            precision=jax.lax.Precision.HIGHEST)

    c1 = (0.01 * val_range) ** 2
    c2 = (0.03 * val_range) ** 2
    mu1, mu2 = conv(x1), conv(x2)
    num0 = mu1 * mu2 * 2.0
    den0 = mu1 ** 2 + mu2 ** 2
    luminance = (num0 + c1) / (den0 + c1)
    num1 = conv(x1 * x2) * 2.0
    den1 = conv(x1 * x1 + x2 * x2)
    cs = (num1 - num0 + c2) / (den1 - den0 + c2)
    ssim_val = jnp.mean(luminance * cs, axis=(-3, -2))
    return 10.0 * jnp.mean((1.0 - ssim_val) / 2.0)


def _make_mask(key, H, W):
    # Deterministic synthetic weight mask mimicking preprocess() on a grayscale
    # uint8 image: integer-divide positives by 16, remap 15->16 and 7->8.
    # (The module loads this mask from disk; recreated in-script instead.)
    raw = jax.random.randint(key, (H, W), 0, 256, dtype=jnp.int32)
    m = jnp.where(raw > 0, raw // 16, raw)
    m = jnp.where(m == 15, 16, m)
    m = jnp.where(m == 7, 8, m)
    return m.astype(jnp.float32)


if __name__ == "__main__":
    key = jax.random.PRNGKey(0)
    k1, k2, k3 = jax.random.split(key, 3)

    # C=3 matches create_window()'s hard-coded 3-channel window in the module.
    B, C, H, W = 2, 3, 16, 16
    img1 = jax.random.uniform(k1, (B, C, H, W), dtype=jnp.float32)
    img2 = jax.random.uniform(k2, (B, C, H, W), dtype=jnp.float32)
    mask = _make_mask(k3, H, W)

    # (1) Exact path: f32 inputs, exact divides -> module semantics to 2e-4.
    loss = jax.block_until_ready(ssim_loss(img1, img2, mask, approx_recip=False))
    ref = jax.block_until_ready(_reference_ssim_loss(img1, img2, mask))
    assert jnp.allclose(loss, ref, rtol=2e-4, atol=2e-4), (loss, ref)

    # (2) Fast path: bf16 HBM inputs + approximate EUP reciprocal, compared against
    #     the reference on the same bf16-quantized inputs (tolerance absorbs the
    #     approximate-reciprocal error only).
    img1_bf = img1.astype(jnp.bfloat16)
    img2_bf = img2.astype(jnp.bfloat16)
    loss_fast = jax.block_until_ready(ssim_loss(img1_bf, img2_bf, mask, approx_recip=True))
    ref_fast = jax.block_until_ready(_reference_ssim_loss(img1_bf, img2_bf, mask))
    assert jnp.allclose(loss_fast, ref_fast, rtol=5e-3, atol=5e-3), (loss_fast, ref_fast)

    print("KERNEL_OK")
</pallas_src>

<mosaic_0001>
module attributes {stable_mosaic.version = 11 : i64} {
  func.func @_ssim_partial_kernel(%arg0: i32, %arg1: i32, %arg2: memref<1x1x16x16xf32, #tpu.memory_space<vmem>>, %arg3: memref<1x1x16x16xf32, #tpu.memory_space<vmem>>, %arg4: memref<16x16xf32, #tpu.memory_space<vmem>>, %arg5: memref<16x128xf32, #tpu.memory_space<vmem>>, %arg6: memref<8x16xf32, #tpu.memory_space<vmem>>, %arg7: memref<1x1x1x1xf32, #tpu.memory_space<vmem>>) attributes {dimension_semantics = [#tpu.dimension_semantics<parallel>, #tpu.dimension_semantics<parallel>], iteration_bounds = array<i64: 2, 3>, scalar_prefetch = 0 : i64, scratch_operands = 0 : i64, tpu.core_type = #tpu.core_type<tc>, window_params = [{transform_indices = @transform_0, window_bounds = array<i64: 1, 1, 16, 16>}, {transform_indices = @transform_1, window_bounds = array<i64: 1, 1, 16, 16>}, {pipeline_mode = #tpu.pipeline_mode<synchronous>, transform_indices = @transform_2, window_bounds = array<i64: 16, 16>}, {pipeline_mode = #tpu.pipeline_mode<synchronous>, transform_indices = @transform_3, window_bounds = array<i64: 16, 128>}, {pipeline_mode = #tpu.pipeline_mode<synchronous>, transform_indices = @transform_4, window_bounds = array<i64: 8, 16>}, {transform_indices = @transform_5, window_bounds = array<i64: 1, 1, 1, 1>}]} {
    %c0 = arith.constant 0 : index
    %c0_0 = arith.constant 0 : index
    %0 = vector.load %arg4[%c0, %c0_0] : memref<16x16xf32, #tpu.memory_space<vmem>>, vector<16x16xf32>
    %c0_1 = arith.constant 0 : index
    %c0_2 = arith.constant 0 : index
    %c0_3 = arith.constant 0 : index
    %c0_4 = arith.constant 0 : index
    %1 = vector.load %arg2[%c0_1, %c0_2, %c0_3, %c0_4] : memref<1x1x16x16xf32, #tpu.memory_space<vmem>>, vector<1x1x16x16xf32>
    %2 = vector.shape_cast %1 : vector<1x1x16x16xf32> to vector<16x16xf32>
    %3 = arith.mulf %2, %0 : vector<16x16xf32>
    %c0_5 = arith.constant 0 : index
    %c0_6 = arith.constant 0 : index
    %c0_7 = arith.constant 0 : index
    %c0_8 = arith.constant 0 : index
    %4 = vector.load %arg3[%c0_5, %c0_6, %c0_7, %c0_8] : memref<1x1x16x16xf32, #tpu.memory_space<vmem>>, vector<1x1x16x16xf32>
    %5 = vector.shape_cast %4 : vector<1x1x16x16xf32> to vector<16x16xf32>
    %6 = arith.mulf %5, %0 : vector<16x16xf32>
    %7 = arith.mulf %3, %6 : vector<16x16xf32>
    %8 = arith.mulf %3, %3 : vector<16x16xf32>
    %9 = arith.mulf %6, %6 : vector<16x16xf32>
    %10 = arith.addf %8, %9 : vector<16x16xf32>
    %11 = tpu.concatenate %3, %6, %7, %10 in 0 : vector<16x16xf32>, vector<16x16xf32>, vector<16x16xf32>, vector<16x16xf32> -> vector<64x16xf32>
    %c0_9 = arith.constant 0 : index
    %c0_10 = arith.constant 0 : index
    %12 = vector.load %arg5[%c0_9, %c0_10] : memref<16x128xf32, #tpu.memory_space<vmem>>, vector<16x128xf32>
    %c0_11 = arith.constant 0 : index
    %c0_12 = arith.constant 0 : index
    %13 = vector.load %arg6[%c0_11, %c0_12] : memref<8x16xf32, #tpu.memory_space<vmem>>, vector<8x16xf32>
    %cst = arith.constant dense<0.000000e+00> : vector<64x128xf32>
    %14 = tpu.matmul %11, %12, %cst {dimension_numbers = #tpu.dot_dimension_numbers<[1], [0], [0], [1], [0, 0, 1, 1], [], []>} : vector<64x16xf32>, vector<16x128xf32>, vector<64x128xf32> -> vector<64x128xf32>
    %15 = vector.extract_strided_slice %14 {offsets = [0, 0], sizes = [16, 128], strides = [1, 1]} : vector<64x128xf32> to vector<16x128xf32>
    %cst_13 = arith.constant dense<0.000000e+00> : vector<8x128xf32>
    %16 = tpu.matmul %13, %15, %cst_13 {dimension_numbers = #tpu.dot_dimension_numbers<[1], [0], [0], [1], [0, 0, 1, 1], [], []>} : vector<8x16xf32>, vector<16x128xf32>, vector<8x128xf32> -> vector<8x128xf32>
    %17 = vector.extract_strided_slice %14 {offsets = [16, 0], sizes = [16, 128], strides = [1, 1]} : vector<64x128xf32> to vector<16x128xf32>
    %cst_14 = arith.constant dense<0.000000e+00> : vector<8x128xf32>
    %18 = tpu.matmul %13, %17, %cst_14 {dimension_numbers = #tpu.dot_dimension_numbers<[1], [0], [0], [1], [0, 0, 1, 1], [], []>} : vector<8x16xf32>, vector<16x128xf32>, vector<8x128xf32> -> vector<8x128xf32>
    %19 = vector.extract_strided_slice %14 {offsets = [32, 0], sizes = [16, 128], strides = [1, 1]} : vector<64x128xf32> to vector<16x128xf32>
    %cst_15 = arith.constant dense<0.000000e+00> : vector<8x128xf32>
    %20 = tpu.matmul %13, %19, %cst_15 {dimension_numbers = #tpu.dot_dimension_numbers<[1], [0], [0], [1], [0, 0, 1, 1], [], []>} : vector<8x16xf32>, vector<16x128xf32>, vector<8x128xf32> -> vector<8x128xf32>
    %21 = vector.extract_strided_slice %14 {offsets = [48, 0], sizes = [16, 128], strides = [1, 1]} : vector<64x128xf32> to vector<16x128xf32>
    %cst_16 = arith.constant dense<0.000000e+00> : vector<8x128xf32>
    %22 = tpu.matmul %13, %21, %cst_16 {dimension_numbers = #tpu.dot_dimension_numbers<[1], [0], [0], [1], [0, 0, 1, 1], [], []>} : vector<8x16xf32>, vector<16x128xf32>, vector<8x128xf32> -> vector<8x128xf32>
    %cst_17 = arith.constant 2.000000e+00 : f32
    %23 = vector.broadcast %cst_17 : f32 to vector<8x128xf32>
    %24 = arith.mulf %23, %16 : vector<8x128xf32>
    %25 = arith.mulf %24, %18 : vector<8x128xf32>
    %26 = arith.mulf %16, %16 : vector<8x128xf32>
    %27 = arith.mulf %18, %18 : vector<8x128xf32>
    %28 = arith.addf %26, %27 : vector<8x128xf32>
    %cst_18 = arith.constant 9.99999974E-5 : f32
    %29 = vector.broadcast %cst_18 : f32 to vector<8x128xf32>
    %30 = arith.addf %25, %29 : vector<8x128xf32>
    %cst_19 = arith.constant 9.99999974E-5 : f32
    %31 = vector.broadcast %cst_19 : f32 to vector<8x128xf32>
    %32 = arith.addf %28, %31 : vector<8x128xf32>
    %cst_20 = arith.constant 2.000000e+00 : f32
    %33 = vector.broadcast %cst_20 : f32 to vector<8x128xf32>
    %34 = arith.mulf %33, %20 : vector<8x128xf32>
    %35 = arith.subf %34, %25 : vector<8x128xf32>
    %cst_21 = arith.constant 8.99999984E-4 : f32
    %36 = vector.broadcast %cst_21 : f32 to vector<8x128xf32>
    %37 = arith.addf %35, %36 : vector<8x128xf32>
    %38 = arith.subf %22, %28 : vector<8x128xf32>
    %cst_22 = arith.constant 8.99999984E-4 : f32
    %39 = vector.broadcast %cst_22 : f32 to vector<8x128xf32>
    %40 = arith.addf %38, %39 : vector<8x128xf32>
    %41 = arith.divf %30, %32 : vector<8x128xf32>
    %42 = arith.divf %37, %40 : vector<8x128xf32>
    %43 = tpu.iota {dimensions = array<i32: 0>} : vector<8x128xi32>
    %44 = tpu.iota {dimensions = array<i32: 1>} : vector<8x128xi32>
    %c6_i32 = arith.constant 6 : i32
    %45 = vector.broadcast %c6_i32 : i32 to vector<8x128xi32>
    %46 = arith.cmpi slt, %43, %45 : vector<8x128xi32>
    %c6_i32_23 = arith.constant 6 : i32
    %47 = vector.broadcast %c6_i32_23 : i32 to vector<8x128xi32>
    %48 = arith.cmpi slt, %44, %47 : vector<8x128xi32>
    %49 = arith.andi %46, %48 : vector<8x128xi1>
    %50 = arith.mulf %41, %42 : vector<8x128xf32>
    %cst_24 = arith.constant 0.000000e+00 : f32
    %51 = vector.broadcast %cst_24 : f32 to vector<8x128xf32>
    %52 = arith.select %49, %50, %51 : vector<8x128xi1>, vector<8x128xf32>
    %53 = vector.shape_cast %52 : vector<8x128xf32> to vector<1x8x128xf32>
    %cst_25 = arith.constant dense<0.000000e+00> : vector<1xf32>
    %54 = vector.multi_reduction <add>, %53, %cst_25 [1, 2] : vector<1x8x128xf32> to vector<1xf32>
    %55 = vector.shape_cast %54 : vector<1xf32> to vector<1x1x1xf32>
    %56 = vector.extract %55[0, 0, 0] : f32 from vector<1x1x1xf32>
    %57 = vector.broadcast %56 : f32 to vector<1x1x1x1xf32>
    %c0_26 = arith.constant 0 : index
    %c0_27 = arith.constant 0 : index
    %c0_28 = arith.constant 0 : index
    %c0_29 = arith.constant 0 : index
    %58 = vector.load %arg7[%c0_26, %c0_27, %c0_28, %c0_29] : memref<1x1x1x1xf32, #tpu.memory_space<vmem>>, vector<1x1x1x1xf32>
    tpu.vector_store %arg7[%c0_26, %c0_27, %c0_28, %c0_29], %57 {strides = array<i32>} : memref<1x1x1x1xf32, #tpu.memory_space<vmem>>, vector<1x1x1x1xf32>,
    return
  }
  func.func @transform_0(%arg0: i32, %arg1: i32) -> (i32, i32, i32, i32) {
    %c0_i32 = arith.constant 0 : i32
    %c0_i32_0 = arith.constant 0 : i32
    %c0_i32_1 = arith.constant 0 : i32
    return %arg0, %arg1, %c0_i32, %c0_i32_0 : i32, i32, i32, i32
  }
  func.func @transform_1(%arg0: i32, %arg1: i32) -> (i32, i32, i32, i32) {
    %c0_i32 = arith.constant 0 : i32
    %c0_i32_0 = arith.constant 0 : i32
    %c0_i32_1 = arith.constant 0 : i32
    return %arg0, %arg1, %c0_i32, %c0_i32_0 : i32, i32, i32, i32
  }
  func.func @transform_2(%arg0: i32, %arg1: i32) -> (i32, i32) {
    %c0_i32 = arith.constant 0 : i32
    %c0_i32_0 = arith.constant 0 : i32
    %c0_i32_1 = arith.constant 0 : i32
    return %c0_i32, %c0_i32_0 : i32, i32
  }
  func.func @transform_3(%arg0: i32, %arg1: i32) -> (i32, i32) {
    %c0_i32 = arith.constant 0 : i32
    %c0_i32_0 = arith.constant 0 : i32
    %c0_i32_1 = arith.constant 0 : i32
    return %c0_i32, %c0_i32_0 : i32, i32
  }
  func.func @transform_4(%arg0: i32, %arg1: i32) -> (i32, i32) {
    %c0_i32 = arith.constant 0 : i32
    %c0_i32_0 = arith.constant 0 : i32
    %c0_i32_1 = arith.constant 0 : i32
    return %c0_i32, %c0_i32_0 : i32, i32
  }
  func.func @transform_5(%arg0: i32, %arg1: i32) -> (i32, i32, i32, i32) {
    %c0_i32 = arith.constant 0 : i32
    %c0_i32_0 = arith.constant 0 : i32
    %c0_i32_1 = arith.constant 0 : i32
    return %arg0, %arg1, %c0_i32, %c0_i32_0 : i32, i32, i32, i32
  }
}

</mosaic_0001>

<bundles_post_ra>
// kernel: tpu_custom_call.1
= control target key start
LH: loop header
LB: loop body
LE: loop exit
PB: predicated region body
PF: predicated region fallthrough
CT: control target
= control target key end

     0   :  { %s1659_s0 = inlined_call_operand.hbm [shape: f32[2,3,16,16], index: 0, kind: input, shape index: {}]   ;;  %s1660_s1 = inlined_call_operand.hbm [shape: f32[2,3,16,16], index: 1, kind: input, shape index: {}]   ;;  %s1661_s2 = inlined_call_operand.hbm [shape: f32[16,16], index: 2, kind: input, shape index: {}]   ;;  %s1662_s3 = inlined_call_operand.hbm [shape: f32[16,128], index: 3, kind: input, shape index: {}]   ;;  %s1663_s4 = inlined_call_operand.hbm [shape: f32[8,16], index: 4, kind: input, shape index: {}]   ;;  %s1664_s5 = inlined_call_operand.vmem [shape: f32[2,3,1,1], index: 5, kind: output, shape index: {}]  }
   0x1   :  { %1673 = sst [smem:[#allocation17_spill]] %s1659_s0 }
   0x2   :  { %1674 = sst [smem:[#allocation18_spill]] %s1661_s2 }
   0x3   :  { %1675 = sst [smem:[#allocation19_spill]] %s1662_s3 }
   0x4   :  { %1676 = sst [smem:[#allocation20_spill]] %s1663_s4 }
   0x5   :  { %10 = vsyncpa [#allocation3], 0 }
   0x6   :  { %12 = vsyncpa [#allocation3 + $0x1], 0 }
   0x7   :  { %13 = vsyncpa [#allocation5], 0 }
   0x8   :  { %15 = vsyncpa [#allocation5 + $0x1], 0 }
   0x9   :  { %16 = vsyncpa [#allocation8], 0  ;;  %s1438_s18 = smov 0   ;;  %s1440_s19 = smov 0  }
   0xa   :  { %s1442_s20 = smov 0   ;;  %s1444_s21 = smov 0  }
   0xb   :  { %s1446_s22 = smov 0   ;;  %s1448_s23 = smov 0  }
   0xc   :  { %s1450_s24 = smov 0   ;;  %s1452_s25 = smov 0  }
   0xd LB: > { %1677 = sst [smem:[#allocation14_spill]] %s1393_s24  ;;  %s1665_s26 = sadd.s32 4294967295, %s1397_s25   ;;  %s1397_s25 = sphi %s1452_s25, %s22_s25   ;;  %s1393_s24 = sphi %s1450_s24, %s1694_s24   ;;  %s1389_s23 = sphi %s1448_s23, %s1699_s23   ;;  %s1385_s22 = sphi %s1446_s22, %s1692_s22   ;;  %s1381_s21 = sphi %s1444_s21, %s1698_s21   ;;  %s1377_s20 = sphi %s1442_s20, %s1697_s20   ;;  %s1373_s19 = sphi %s1440_s19, %s1696_s19   ;;  %s1369_s18 = sphi %s1438_s18, %s1695_s18  }
   0xe   : > { %p56_p0 = scmp.ne.s32.totalorder %s1373_s19, %s1369_s18  ;;  %p1480_p1 = scmp.eq.s32.totalorder %s1665_s26, 0 }
   0xf   : > { %p968_p2 = scmp.ge.s32.totalorder %s1397_s25, 1  ;;  %p186_p3 = scmp.lt.s32.totalorder %s1397_s25, 7 }
  0x10   : > { %p1488_p4 = por %p1480_p1, %p56_p0  ;;  %s1399_s30 = smov [#allocation6]  }
  0x11   : > { %p1492_p5 = pnand %p968_p2, %p186_p3  ;;  %s198_s6 = sshll.u32 %s1399_s30, 4  ;;  %s199_s6 = int_to_ptr.vmem [resolvable:$true] %s198_s6 }
  0x12   : > { %s1400_s8 = smov [#allocation7]   ;;  %s1401_s10 = smov [#allocation9]  }
  0x13   : > { %p1086_p6 = pneg %p1492_p5  ;;  %s211_s9 = sshll.u32 %s1400_s8, 4  ;;  %s212_s9 = int_to_ptr.vmem [resolvable:$true] %s211_s9 }
  0x14   : > { %s225_s11 = sshll.u32 %s1401_s10, 4  ;;  %s1196_s12 = scalar_lea.vmem %s199_s6, 256  ;;  %s226_s11 = int_to_ptr.vmem [resolvable:$true] %s225_s11 }
  0x15   : > { %p1500_p7 = pnand %p1086_p6, %p1480_p1  ;;  %p1197_p9 = scmp.ne.s32.totalorder %s199_s6, %s1196_s12 }
  0x16   : > { %p1204_p12 = scmp.lt.s32.totalorder %s199_s6, %s199_s6  ;;  %p1205_p13 = scmp.lt.s32.totalorder %s1196_s12, %s1196_s12 }
  0x17   : > { %p1187_p8 = pneg %p1500_p7 }
  0x18   : > { %p1206_p0 = por %p1205_p13, %p1204_p12 }
  0x19   : > { %p1199_p10 = pnand %p1197_p9, %p1187_p8 }
  0x1b   : > { %p1200_p11 = pneg %p1199_p10 }
  0x1d   : > { %p1207_p2 = pnand %p1206_p0, %p1200_p11 }
  0x1f   : > { %1210 = shalt.err (!%p1207_p2)
}
  0x20   : > { %s1666_s13 = smov 128   ;;  %s1668_s14 = smov 8  }
  0x21   : > { %s1682_s2 = sld [smem:[#allocation18_spill]]  ;;  %s1222_s17 = scalar_lea.vmem %s212_s9, 256 }
  0x22   : > { %p1223_p3 = scmp.ne.s32.totalorder %s212_s9, %s1222_s17  ;;  %p1230_p10 = scmp.lt.s32.totalorder %s212_s9, %s212_s9 }
  0x23   : > { %p1231_p11 = scmp.lt.s32.totalorder %s1222_s17, %s1222_s17 }
  0x24   : > { %p1225_p6 = pnand %p1223_p3, %p1187_p8 }
  0x25   : > { %p1232_p12 = por %p1231_p11, %p1230_p10 }
  0x26   : > { %p1226_p9 = pneg %p1225_p6 }
  0x27   : > { %1089 = dma.hbm_to_vmem [thread:$0]  (!%p1500_p7), %s1682_s2, 256, %s199_s6, [#allocation5], %s1666_s13, %s1666_s13, %s1668_s14  }
  0x28   : > { %p1233_p13 = pnand %p1232_p12, %p1226_p9 }
  0x2a   : > { %1236 = shalt.err (!%p1233_p13)
}
  0x2b   : > { %s1683_s3 = sld [smem:[#allocation19_spill]]  ;;  %s1248_s6 = scalar_lea.vmem %s226_s11, 128 }
  0x2c   : > { %p1249_p0 = scmp.ne.s32.totalorder %s226_s11, %s1248_s6  ;;  %p1256_p6 = scmp.lt.s32.totalorder %s226_s11, %s226_s11 }
  0x2d   : > { %p1257_p9 = scmp.lt.s32.totalorder %s1248_s6, %s1248_s6 }
  0x2e   : > { %p1251_p2 = pnand %p1249_p0, %p1187_p8 }
  0x2f   : > { %p1258_p10 = por %p1257_p9, %p1256_p6 }
  0x30   : > { %p1252_p3 = pneg %p1251_p2 }
  0x31   : > { %1092 = dma.hbm_to_vmem [thread:$0]  (!%p1500_p7), %s1683_s3, 256, %s212_s9, [#allocation8], %s1666_s13, %s1666_s13, %s1668_s14  }
  0x32   : > { %p1259_p11 = pnand %p1258_p10, %p1252_p3 }
  0x34   : > { %1262 = shalt.err (!%p1259_p11)
}
  0x35   : > { %s1684_s4 = sld [smem:[#allocation20_spill]]  ;;  %s31_s9 = sadd.s32 1, %s1389_s23 }
  0x36   : > { %p32_p8 = scmp.ge.s32.totalorder %s31_s9, 3  ;;  %s34_s12 = sadd.s32 1, %s1393_s24 }
  0x37   : > { %s43_s7 = sadd.s32 1, %s1377_s20  ;;  %p50_p12 = scmp.ne.s32.totalorder %s1377_s20, %s1373_s19 }
  0x38   : > { %s1701_s9 = smov (%p32_p8, %s31_s9), 0  ;;  %s1703_s12 = smov (!%p32_p8, %s34_s12), %s1393_s24 }
  0x39   : > { %1685 = sst [smem:[#allocation15_spill]] %s1701_s9  ;;  %s39_s15 = ssub.s32 %s1389_s23, %s1701_s9 }
  0x3a   : > { %p51_p13 = scmp.eq.s32.totalorder %s1397_s25, 0  ;;  %p36_p0 = scmp.ge.s32.totalorder %s1703_s12, 2 }
  0x3b   : > { %1095 = dma.hbm_to_vmem [thread:$0]  (!%p1500_p7), %s1684_s4, 128, %s226_s11, [#allocation8]  }
  0x3c   : > { %p1106_p2 = scmp.lt.s32.totalorder %s1397_s25, 6  ;;  %p52_p3 = por %p51_p13, %p50_p12 }
  0x3d   : > { %s236_s16 = sand.u32 1, %s1377_s20   ;;  %s1705_s12 = smov (%p36_p0, %s1703_s12), 0 }
  0x3e   : > { %1686 = sst [smem:[#allocation16_spill]] %s1705_s12  ;;  %s1551_s11 = sshll.u32 %s236_s16, 4 }
  0x3f   : > { %s38_s17 = ssub.s32 %s1393_s24, %s1705_s12  ;;  %s974_s30 = sshll.u32 %s1389_s23, 1 }
  0x40   : > { %s40_s18 = sor.u32 %s39_s15, %s38_s17  ;;  %s1065_s6 = smul.u32 6, %s1393_s24 }
  0x41   : > { %p41_p7 = scmp.eq.s32.totalorder %s40_s18, 0  ;;  %s240_s8 = scalar_lea.vmem [#allocation2], %s1551_s11 }
  0x42   : > { %s249_s10 = sshll.u32 %s240_s8, 4  ;;  %p1558_p6 = pnand %p1106_p2, %p52_p3  ;;  %s250_s10 = int_to_ptr.vmem [resolvable:$true] %s249_s10 }
  0x43   : > { %s1563_s13 = scalar_select %p41_p7, %s1377_s20, %s43_s7  }
  0x44   : > { %s246_s14 = sadd.s32 %s1065_s6, %s974_s30  ;;  %s1688_s0 = sld [smem:[#allocation17_spill]] }
  0x45   : > { %s975_s2 = sshll.u32 %s246_s14, 7  ;;  %s237_s17 = scalar_lea.sflag [#allocation3], %s236_s16 }
  0x46   : > { %p1265_p9 = pneg %p1558_p6  ;;  %s1276_s18 = scalar_lea.vmem %s250_s10, 256 }
  0x47   : > { %p1277_p10 = scmp.ne.s32.totalorder %s250_s10, %s1276_s18  ;;  %s1404_s8 = smov [#allocation2]  }
  0x48   : > { %s1281_s12 = sshll.u32 %s1404_s8, 4  ;;  %s1282_s12 = int_to_ptr.vmem [resolvable:$false] %s1281_s12 }
  0x49   : > { %p1279_p11 = pnand %p1277_p10, %p1265_p9  ;;  %s1283_s7 = scalar_lea.vmem %s1282_s12, 512 }
  0x4a   : > { %s248_s15 = scalar_lea.hbm %s1688_s0, %s975_s2  ;;  %p1284_p12 = scmp.lt.s32.totalorder %s250_s10, %s1282_s12 }
  0x4b   : > { %p1280_p8 = pneg %p1279_p11  ;;  %p1285_p13 = scmp.lt.s32.totalorder %s1283_s7, %s1276_s18 }
  0x4d   : > { %p1286_p0 = por %p1285_p13, %p1284_p12 }
  0x4f   : > { %p1287_p2 = pnand %p1286_p0, %p1280_p8 }
  0x51   : > { %1290 = shalt.err (!%p1287_p2)
}
  0x52   : > { %s1689_s3 = smov 8   ;;  %s1690_s4 = smov 128  }
  0x53   : > { %1099 = dma.hbm_to_vmem [thread:$0]  (!%p1558_p6), %s248_s15, 256, %s250_s10, %s237_s17, %s1690_s4, %s1690_s4, %s1689_s3  }
  0x54   : > { %s271_s30 = scalar_lea.hbm %s1660_s1, %s975_s2  ;;  %s263_s6 = scalar_lea.vmem [#allocation4], %s1551_s11 }
  0x55   : > { %s272_s8 = sshll.u32 %s263_s6, 4  ;;  %s259_s12 = sand.u32 1, %s1397_s25   ;;  %s273_s8 = int_to_ptr.vmem [resolvable:$true] %s272_s8 }
  0x56   : > { %s260_s18 = scalar_lea.sflag [#allocation5], %s259_s12  ;;  %s1304_s7 = scalar_lea.vmem %s273_s8, 256 }
  0x57   : > { %p1305_p3 = scmp.ne.s32.totalorder %s273_s8, %s1304_s7  ;;  %s1405_s0 = smov [#allocation4]  }
  0x58   : > { %s1309_s9 = sshll.u32 %s1405_s0, 4  ;;  %s1310_s9 = int_to_ptr.vmem [resolvable:$false] %s1309_s9 }
  0x59   : > { %p1307_p7 = pnand %p1305_p3, %p1265_p9  ;;  %s1311_s24 = scalar_lea.vmem %s1310_s9, 512 }
  0x5a   : > { %p1312_p11 = scmp.lt.s32.totalorder %s273_s8, %s1310_s9  ;;  %p1313_p8 = scmp.lt.s32.totalorder %s1311_s24, %s1304_s7 }
  0x5b   : > { %p1308_p10 = pneg %p1307_p7 }
  0x5c   : > { %p1314_p12 = por %p1313_p8, %p1312_p11 }
  0x5e   : > { %p1315_p13 = pnand %p1314_p12, %p1308_p10 }
  0x60   : > { %1318 = shalt.err (!%p1315_p13)
}
  0x61   : > { %1102 = dma.hbm_to_vmem [thread:$0]  (!%p1558_p6), %s271_s30, 256, %s273_s8, %s260_s18, %s1690_s4, %s1690_s4, %s1689_s3  }
  0x62   : > { %284 = sbr.rel (%p1492_p5) target bundleno = 744 (0x2e8), region = 40  ;;  %s286_s2 = sand.u32 (!%p1492_p5), 1, %s1373_s19  }
  0x63   : > { %s980_s0 = sshll.u32 (!%p1492_p5), %s286_s2, 4  ;;  %s287_s11 = scalar_lea.sflag (!%p1492_p5), [#allocation3], %s286_s2 }
  0x64   : > { %s290_s10 = scalar_lea.vmem (!%p1492_p5), [#allocation2], %s980_s0 }
  0x67   : > { %1352 = dma.done.wait (%p1488_p4), %s287_s11, 256  }
  0x68   : > { %1354 = vsyncadd (%p1488_p4), %s287_s11, 4294967040  ;;  %s1691_s24 = sadd.s32 4294967295, %s1397_s25   ;;  %s299_s15 = scalar_lea.vmem [#allocation4], %s980_s0 }
  0x69   : > { %s295_s26 = sand.u32 1, %s1691_s24  }
  0x6a   : > { %s296_s9 = scalar_lea.sflag [#allocation5], %s295_s26 }
  0x6b   : > { %1356 = dma.done.wait (%p1488_p4), %s296_s9, 256  }
  0x6c   : > { %1358 = vsyncadd (%p1488_p4), %s296_s9, 4294967040 }
  0x6d   : > { %1360 = dma.done.wait (%p1480_p1), [#allocation5], 256  }
  0x6e   : > { %1362 = vsyncadd (%p1480_p1), [#allocation5], 4294967040 }
  0x6f   : > { %1364 = dma.done.wait (%p1480_p1), [#allocation8], 384  }
  0x70   : > { %1366 = vsyncadd (%p1480_p1), [#allocation8], 4294966912  ;;  %v371_v0 = vld [vmem:[#allocation7 + $0x8] sm:$0xff]  ;;  %v370_v1 = vld [vmem:[#allocation7] sm:$0xff]  ;;  %vm373_vm0 = vcmask 130048   ;;  %v1406_v20 = vmov 0.0   ;;  %v802_v46 = vlaneseq }
  0x71   : > { %v352_v2 = vld [vmem:[#allocation6] sm:$0xff]  ;;  %1021 = vmatprep.subr.mxu0 %v371_v0  ;;  %v353_v5 = vld [vmem:[#allocation6 + $0x8] sm:$0xff]  ;;  %1037 = vmatprep.subr.mxu1 %v1406_v20  ;;  %vm1407_vm1 = vmmov 0   ;;  %p345_p1 = scmp.lt.s32.totalorder %s1385_s22, 1  ;;  %p347_p4 = scmp.lt.s32.totalorder %s1381_s21, 2  ;;  %vm821_vm5 = vcmask 0  }
  0x72   : > { %v354_v3 = vld [vmem:[%s290_s10] sm:$0xff]  ;;  %1022 = vmatpush3.msra.mxu0 %v371_v0  ;;  %v355_v8 = vld [vmem:[%s290_s10 + $0x8] sm:$0xff]  ;;  %1041 = vmatprep.mubr.msk.f32.mxu1 %vm1407_vm1, %v1406_v20  ;;  %v803_v49 = vshrl.u32 %v802_v46, 7  ;;  %v805_v50 = vand.u32 127, %v802_v46 }
  0x73   : > { %v358_v4 = vld [vmem:[%s299_s15] sm:$0xff]  ;;  %v356_v6 = vmul.f32 %v354_v3, %v352_v2  ;;  %v359_v9 = vld [vmem:[%s299_s15 + $0x8] sm:$0xff]  ;;  %1023 = vmatprep.subr.mxu0 %v370_v1  ;;  %v357_v10 = vmul.f32 %v355_v8, %v353_v5  ;;  %s1707_s22 = smov (!%p345_p1, %s1385_s22), 1  ;;  %s1709_s21 = smov (!%p347_p4, %s1381_s21), 2 }
  0x74   : > { %v360_v7 = vmul.f32 %v358_v4, %v352_v2  ;;  %1024 = vmatpush3.msra.mxu0 %v370_v1  ;;  %v361_v11 = vmul.f32 %v359_v9, %v353_v5  ;;  %v372_v22 = vld [vmem:[#allocation9] sm:$0xff]  ;;  %vm806_vm2 = vcmp.lt.s32.totalorder %v803_v49, 6  ;;  %vm807_vm3 = vcmp.lt.s32.totalorder %v805_v50, 6  ;;  %s1067_s27 = smul.u32 3, %s1707_s22 }
  0x75   : > { %1025 = vmatprep.mubr.msk.f32.mxu0 %vm373_vm0, %v356_v6  ;;  %v364_v12 = vmul.f32 %v356_v6, %v356_v6  ;;  %v365_v16 = vmul.f32 %v357_v10, %v357_v10  ;;  %vm808_vm4 = vmand %vm806_vm2, %vm807_vm3 }
  0x76   : > { %1026 = vmatmul.mubr.msk.f32.vlgmr.msra.gmra.mxu0 %vm373_vm0, %v357_v10  ;;  %v362_v13 = vmul.f32 %v360_v7, %v356_v6  ;;  %v366_v14 = vmul.f32 %v360_v7, %v360_v7  ;;  %v363_v15 = vmul.f32 %v361_v11, %v357_v10  ;;  %v367_v17 = vmul.f32 %v361_v11, %v361_v11  ;;  %s350_s28 = sadd.s32 %s1067_s27, %s1709_s21 }
  0x77   : > { %1028 = vmatprep.mubr.msk.f32.mxu0 %vm373_vm0, %v360_v7  ;;  %s351_s3 = scalar_lea.vmem %s1664_s5, %s350_s28 }
  0x78   : > { %v368_v18 = vadd.f32 %v366_v14, %v364_v12  ;;  %v369_v19 = vadd.f32 %v367_v17, %v365_v16 }
  0x7a   : > { %1029 = vmatmul.mubr.msk.f32.gmra.mxu0 %vm373_vm0, %v361_v11 }
  0x7b   : > { %1031 = vmatprep.mubr.msk.f32.mxu0 %vm373_vm0, %v362_v13 }
  0x7e   : > { %1032 = vmatmul.mubr.msk.f32.gmra.mxu0 %vm373_vm0, %v363_v15 }
  0x7f   : > { %1034 = vmatprep.mubr.msk.f32.mxu0 %vm373_vm0, %v368_v18 }
  0x82   : > { %1035 = vmatmul.mubr.msk.f32.gmra.mxu0 %vm373_vm0, %v369_v19 }
 0x136   : > { %v1027_v21 = vpop.f32.mrf.mxu0 }
 0x137   : > { %1038 = vmatpush3.msra.mxu1 %v1027_v21 }
 0x138   : > { %v464_v23 = vpop.f32.mrf.mxu0  ;;  %1039 = vmatprep.subr.mxu1 %v1406_v20 }
 0x139   : > { %1040 = vmatpush3.msra.mxu1 %v464_v23 }
 0x13a   : > { %v1030_v24 = vpop.f32.mrf.mxu0  ;;  %1042 = vmatmul.mubr.msk.f32.vlgmr.msra.gmra.mxu1 %vm373_vm0, %v372_v22  ;;  %1044 = vmatprep.subr.mxu1 %v1406_v20 }
 0x13b   : > { %1045 = vmatpush3.msra.mxu1 %v1030_v24  ;;  %1048 = vmatprep.mubr.msk.f32.mxu1 %vm1407_vm1, %v1406_v20 }
 0x13c   : > { %v474_v25 = vpop.f32.mrf.mxu0  ;;  %1046 = vmatprep.subr.mxu1 %v1406_v20 }
 0x13d   : > { %1047 = vmatpush3.msra.mxu1 %v474_v25 }
 0x13e   : > { %v1033_v26 = vpop.f32.mrf.mxu0  ;;  %1049 = vmatmul.mubr.msk.f32.vlgmr.msra.gmra.mxu1 %vm373_vm0, %v372_v22  ;;  %1051 = vmatprep.subr.mxu1 %v1406_v20 }
 0x13f   : > { %1052 = vmatpush3.msra.mxu1 %v1033_v26  ;;  %1055 = vmatprep.mubr.msk.f32.mxu1 %vm1407_vm1, %v1406_v20 }
 0x140   : > { %v484_v27 = vpop.f32.mrf.mxu0  ;;  %1053 = vmatprep.subr.mxu1 %v1406_v20 }
 0x141   : > { %1054 = vmatpush3.msra.mxu1 %v484_v27 }
 0x142   : > { %v1036_v28 = vpop.f32.mrf.mxu0  ;;  %1056 = vmatmul.mubr.msk.f32.vlgmr.msra.gmra.mxu1 %vm373_vm0, %v372_v22  ;;  %1058 = vmatprep.subr.mxu1 %v1406_v20 }
 0x143   : > { %1059 = vmatpush3.msra.mxu1 %v1036_v28  ;;  %1062 = vmatprep.mubr.msk.f32.mxu1 %vm1407_vm1, %v1406_v20 }
 0x144   : > { %v494_v29 = vpop.f32.mrf.mxu0  ;;  %1060 = vmatprep.subr.mxu1 %v1406_v20 }
 0x145   : > { %1061 = vmatpush3.msra.mxu1 %v494_v29 }
 0x146   : > { %1063 = vmatmul.mubr.msk.f32.vlgmr.msra.gmra.mxu1 %vm373_vm0, %v372_v22 }
 0x1fa   : > { %v572_v30 = vpop.f32.mrf.mxu1 }
 0x1fb   : > { %v788_v33 = vmul.f32 %v572_v30, %v572_v30  ;;  %v786_v44 = vmul.f32 2.0, %v572_v30 }
 0x1fc   : > { %v1043_v31 = vpop.f32.mrf.mxu1 }
 0x1fe   : > { %v642_v32 = vpop.f32.mrf.mxu1 }
 0x1ff   : > { %v789_v34 = vmul.f32 %v642_v32, %v642_v32  ;;  %v787_v47 = vmul.f32 %v786_v44, %v642_v32 }
 0x200   : > { %v1050_v35 = vpop.f32.mrf.mxu1 }
 0x201   : > { %v790_v36 = vadd.f32 %v789_v34, %v788_v33  ;;  %v791_v52 = vadd.f32 0.0001, %v787_v47 }
 0x202   : > { %v712_v37 = vpop.f32.mrf.mxu1 }
 0x203   : > { %v792_v39 = vadd.f32 0.0001, %v790_v36  ;;  %v793_v45 = vmul.f32 2.0, %v712_v37 }
 0x204   : > { %v1057_v38 = vpop.f32.mrf.mxu1 }
 0x205   : > { %1181 = vrcp.f32 %v792_v39  ;;  %v794_v48 = vsub.f32 %v793_v45, %v787_v47 }
 0x206   : > { %v782_v40 = vpop.f32.mrf.mxu1 }
 0x207   : > { %v796_v41 = vsub.f32 %v782_v40, %v790_v36  ;;  %v795_v53 = vadd.f32 0.0009, %v794_v48 }
 0x208   : > { %v1064_v42 = vpop.f32.mrf.mxu1 }
 0x209   : > { %v797_v43 = vadd.f32 0.0009, %v796_v41 }
 0x20b   : > { %1183 = vrcp.f32 %v797_v43 }
 0x212   : > { %v1182_v51 = vpop.eup %1181 }
 0x213   : > { %v799_v55 = vmul.f32 %v1182_v51, %v791_v52 }
 0x218   : > { %v1184_v54 = vpop.eup %1183 }
 0x219   : > { %v801_v56 = vmul.f32 %v1184_v54, %v795_v53 }
 0x21b   : > { %v809_v57 = vmul.f32 %v801_v56, %v799_v55 }
 0x21d   : > { %v810_v58 = vsel %vm808_vm4, %v809_v57, 0.0 }
 0x21e   : > { %811 = vadd.xlane.f32.xlu0 %v810_v58 }
 0x2a7   : > { %v812_v59 = vpop.xlane.xlu0 %811 }
 0x2a8   : > { %v813_v60 = vrot.slane %v812_v59, 4 }
 0x2aa   : > { %v814_v61 = vadd.f32 %v813_v60, %v812_v59 }
 0x2ac   : > { %v815_v62 = vrot.slane %v814_v61, 2 }
 0x2ae   : > { %v816_v63 = vadd.f32 %v815_v62, %v814_v61 }
 0x2b0   : > { %v817_v0 = vrot.slane %v816_v63, 1 }
 0x2b2   : > { %v818_v1 = vadd.f32 %v817_v0, %v816_v63 }
 0x2b4   : > { %1068 = vpush %v818_v1 }
 0x2e5   : > { %s1069_s4 = spop %1068 }
 0x2e6   : > { %v820_v2 = vstv %s1069_s4 }
 0x2e7   : > { %822 = vst.msk [vmem:[%s351_s3] sm:$0x1] %vm821_vm5, %v820_v2 }
 0x2e8 PF: > { %s22_s25 = sadd.s32 1, %s1397_s25   ;;  %s1692_s22 = sld [smem:[#allocation14_spill]] }
 0x2e9   : > { %p19_p5 = scmp.ge.s32.totalorder %s22_s25, 8   ;;  %s1693_s14 = sld [smem:[#allocation15_spill]] }
 0x2ea   : > { %s1694_s24 = sld [smem:[#allocation16_spill]]  ;;  %s1695_s18 = smov %s1373_s19 }
 0x2eb   : > { %s1696_s19 = smov %s1377_s20  ;;  %s1697_s20 = smov %s1563_s13 }
 0x2ec   : > { %s1698_s21 = smov %s1389_s23  ;;  %21 = sbr.rel (!%p19_p5) target bundleno = 13 (0xd), region = 105 }
 0x2ef   : > { %s1699_s23 = smov %s1693_s14 }
 0x2f1   :  { %848 = vsyncpa [#allocation3], 1 }
 0x2f2   :  { %850 = vsyncpa [#allocation3 + $0x1], 1 }
 0x2f3   :  { %851 = vsyncpa [#allocation5], 1 }
 0x2f4   :  { %853 = vsyncpa [#allocation5 + $0x1], 1 }
 0x2f5   :  { %854 = vsyncpa [#allocation8], 1 }

</bundles_post_ra>
